<compile_context>
chip_gen: v6e
topology: v6e:2x2x1
jax: 0.10.0
libtpu: 0.0.40
codegen_flags: <defaults>
</compile_context>

<pallas_src>
import jax
import jax.numpy as jnp
from jax.experimental import pallas as pl
from jax.experimental.pallas import tpu as pltpu


# ---------------------------------------------------------------- utilities
def _round_up(x, m):
    return ((x + m - 1) // m) * m


def _tpu_kind():
    try:
        return jax.devices()[0].device_kind.lower()
    except Exception:
        return ""


def _vmem_capacity_bytes():
    try:
        return int(pltpu.get_tpu_info().vmem_capacity_bytes)
    except Exception:
        return 64 * 1024 * 1024            # conservative (v7x-sized) default


def _num_cores_guess(kind):
    return 2 if "v7" in kind else 1        # v7x: 2 TensorCores per chip


def _flops_per_byte_limit(kind):
    # Approximate f32 MXU-peak / HBM-BW crossover per generation, with margin.
    if "v6" in kind:
        return 500                         # ~918 TF/s vs ~1.3 TB/s
    if "v7" in kind:
        return 250                         # ~1 PF/s vs ~3.2 TB/s (per TC)
    return 150                             # v5e (~197 TF/s / ~0.8 TB/s) / unknown


def _sublane_multiple(dtype):
    itemsize = jnp.dtype(dtype).itemsize
    return max(8, 8 * (4 // max(1, itemsize)))   # 8 f32 / 16 bf16 / 32 int8,fp8


def _pick_tile_m(M, row_in_elems, row_out_elems, itemsize, resident_bytes,
                 vmem_budget, sublane, min_grid):
    """Largest sublane-aligned M tile that fits the VMEM budget while keeping
    the grid at least `min_grid` steps long (pipeline overlap / megacore)."""
    per_row = 2 * (row_in_elems + row_out_elems) * itemsize   # double-buffered
    avail = max(vmem_budget - resident_bytes, per_row * sublane)
    tm = max(sublane, (avail // per_row) // sublane * sublane)
    if min_grid > 1 and M >= min_grid * sublane:
        tm = min(tm, max(sublane, (M // min_grid) // sublane * sublane))
    if tm >= M:
        return M                            # full dim: always a legal block
    # Prefer a tile that divides M so the last step has no masked ragged tail.
    lo = max(sublane, tm // 2)
    for cand in range(tm, lo - 1, -sublane):
        if M % cand == 0:
            return cand
    return tm                               # ragged tail handled by masking


# ------------------------------------------------------------------ kernels
def _gcn_blockdiag_kernel(x_ref, a_ref, o_ref):
    # x_ref: (tm, K), a_ref: (K, Woutp) VMEM-resident, o_ref: (tm, Woutp)
    o_ref[...] = jnp.dot(
        x_ref[...], a_ref[...], preferred_element_type=jnp.float32
    ).astype(o_ref.dtype)


def _gcn_loop_t_kernel(x_ref, a_ref, o_ref):
    # x_ref: (tm, T, V), a_ref: (T, V, W) VMEM-resident, o_ref: (tm, T*Wp)
    T, _, W = a_ref.shape
    Wp = o_ref.shape[1] // T
    # TODO(synk): for very large T, bound vreg live ranges with a loop/grid
    # axis; static unroll is fine for typical T.
    for t in range(T):
        r = jnp.dot(x_ref[:, t, :], a_ref[t],
                    preferred_element_type=jnp.float32).astype(o_ref.dtype)
        if Wp != W:
            r = jnp.concatenate(
                [r, jnp.zeros((r.shape[0], Wp - W), r.dtype)], axis=1)
        o_ref[:, pl.ds(t * Wp, Wp)] = r     # 128-aligned, lane-dense store


# ------------------------------------------------------------------ wrapper
def graph_convolution(x, A, kernel_size, compute_dtype=None):
    """Pallas equivalent of einsum('nctv,tvw->nctw', x, A).

    compute_dtype: optional lower-precision dtype (e.g. jnp.bfloat16) for the
    kernel inputs (HBM-bound op -> ~2x); accumulation stays f32 and the output
    keeps x's original dtype.  Default None = exact original semantics.
    """
    assert A.shape[0] == kernel_size, "A.shape[0] must equal kernel_size"
    N, C, T, V = x.shape
    Ta, Va, W = A.shape
    assert Ta == T and Va == V

    out_dtype = x.dtype
    if compute_dtype is not None:
        x = x.astype(compute_dtype)
        A = A.astype(compute_dtype)
    itemsize = jnp.dtype(x.dtype).itemsize

    M = N * C
    K, Wout = T * V, T * W
    Woutp = _round_up(Wout, 128)            # lane-dense output block width

    kind = _tpu_kind()
    vmem_cap = _vmem_capacity_bytes()
    vmem_budget = int(vmem_cap * 0.75)      # ~96 MiB v5e/v6e, ~48 MiB v7x
    vmem_limit = int(vmem_cap * 0.85)
    sublane = _sublane_multiple(x.dtype)
    min_grid = 2 * _num_cores_guess(kind)   # >=2 steps per core
    compiler_params = pltpu.CompilerParams(
        dimension_semantics=("parallel",),
        vmem_limit_bytes=vmem_limit,
    )

    # Fast-path gate: block-diagonal A must fit comfortably in VMEM AND the
    # T-times FLOP inflation must keep the kernel HBM-bound on this chip.
    a_bd_bytes = K * Woutp * itemsize
    blockdiag_cap = vmem_budget // 4        # ~24 MiB v5e/v6e, ~12 MiB v7x
    intensity = (2.0 * K * Woutp) / ((K + Woutp) * itemsize)   # flops / HBM byte
    use_blockdiag = (a_bd_bytes <= blockdiag_cap
                     and intensity <= _flops_per_byte_limit(kind))

    if use_blockdiag:
        x_flat = x.reshape(M, K)                                 # free reshape
        # a_bd[t*V + v, t2*W + w] = delta(t, t2) * A[t, v, w].  Tiny; built at
        # trace time -- jit the caller so it is not re-dispatched every call.
        eye_t = jnp.eye(T, dtype=A.dtype)
        a_bd = (eye_t[:, None, :, None] * A[:, :, None, :]).reshape(K, Wout)
        if Woutp != Wout:
            a_bd = jnp.pad(a_bd, ((0, 0), (0, Woutp - Wout)))

        tm = _pick_tile_m(M, K, Woutp, itemsize, 2 * a_bd_bytes,
                          vmem_budget, sublane, min_grid)
        grid_m = pl.cdiv(M, tm)
        cost = pl.CostEstimate(
            flops=2 * M * K * Woutp, transcendentals=0,
            bytes_accessed=(M * K + K * Woutp + M * Woutp) * itemsize)

        def call(single_buffer_a):
            a_kwargs = ({"pipeline_mode": pl.Buffered(1)}
                        if single_buffer_a else {})
            return pl.pallas_call(
                _gcn_blockdiag_kernel,
                out_shape=jax.ShapeDtypeStruct((M, Woutp), out_dtype),
                grid_spec=pltpu.PrefetchScalarGridSpec(
                    num_scalar_prefetch=0,
                    grid=(grid_m,),
                    in_specs=[
                        pl.BlockSpec((tm, K), lambda i: (i, 0)),
                        pl.BlockSpec((K, Woutp), lambda i: (0, 0), **a_kwargs),
                    ],
                    out_specs=pl.BlockSpec((tm, Woutp), lambda i: (i, 0)),
                ),
                compiler_params=compiler_params,
                cost_estimate=cost,
            )(x_flat, a_bd)

        try:
            out_flat = call(True)      # A has a constant index_map: single-
        except Exception:              # buffer it; retry without the hint if
            out_flat = call(False)     # this Pallas build rejects Buffered(1).
        if Woutp != Wout:
            out_flat = out_flat[:, :Wout]
        return out_flat.reshape(N, C, T, W)

    # --- Fallback: large T*V / T*W (block-diag would flip MXU-bound or blow
    # --- VMEM).  Keep the (M, T, V) layout, loop T in the body, write per-t
    # --- slabs into a flattened lane-padded output (unmasked stores).
    Wp = _round_up(W, 128)
    x_mtv = x.reshape(M, T, V)                                   # free reshape
    a_bytes = T * V * W * itemsize
    # TODO(synk): if A itself exceeds VMEM, a K-tiled accumulator variant is
    # needed; here A stays VMEM-resident.
    tm = _pick_tile_m(M, T * V, T * Wp, itemsize, 2 * a_bytes,
                      vmem_budget, sublane, min_grid)
    grid_m = pl.cdiv(M, tm)
    cost = pl.CostEstimate(
        flops=2 * M * T * V * W, transcendentals=0,
        bytes_accessed=(M * T * V + T * V * W + M * T * Wp) * itemsize)

    def call_fb(single_buffer_a):
        a_kwargs = ({"pipeline_mode": pl.Buffered(1)}
                    if single_buffer_a else {})
        return pl.pallas_call(
            _gcn_loop_t_kernel,
            out_shape=jax.ShapeDtypeStruct((M, T * Wp), out_dtype),
            grid_spec=pltpu.PrefetchScalarGridSpec(
                num_scalar_prefetch=0,
                grid=(grid_m,),
                in_specs=[
                    pl.BlockSpec((tm, T, V), lambda i: (i, 0, 0)),
                    pl.BlockSpec((T, V, W), lambda i: (0, 0, 0), **a_kwargs),
                ],
                out_specs=pl.BlockSpec((tm, T * Wp), lambda i: (i, 0)),
            ),
            compiler_params=compiler_params,
            cost_estimate=cost,
        )(x_mtv, A)

    try:
        out_flat = call_fb(True)
    except Exception:
        out_flat = call_fb(False)
    out_mtw = out_flat.reshape(M, T, Wp)
    if Wp != W:
        out_mtw = out_mtw[:, :, :W]
    return out_mtw.reshape(N, C, T, W)


class GraphConvolution:
    """JAX/Pallas port of the PyTorch GraphConvolution module (forward only).

    The PyTorch forward holds no learnable parameters; it only validates A's
    leading dim and applies the einsum contraction (.contiguous() is a no-op
    in JAX).
    """

    def __init__(self, in_channels, out_channels, kernel_size,
                 t_kernel_size=1, t_stride=1, t_padding=0, t_dilation=1,
                 bias=True):
        self.kernel_size = kernel_size

    def __call__(self, x, A):
        return graph_convolution(x, A, self.kernel_size)


if __name__ == "__main__":
    key = jax.random.PRNGKey(0)
    kx, ka = jax.random.split(key)

    # x: (N, C, T, V), A: (T, V, W) with T == kernel_size
    N, C, T, V, W = 2, 4, 8, 16, 16
    x = jax.random.normal(kx, (N, C, T, V), dtype=jnp.float32)
    A = jax.random.normal(ka, (T, V, W), dtype=jnp.float32)

    module = GraphConvolution(in_channels=C, out_channels=C, kernel_size=T)
    fwd = jax.jit(module.__call__)           # avoids per-call a_bd rebuild /
    out = jax.block_until_ready(fwd(x, A))   # dispatch overhead

    # Reference check against plain-JAX einsum
    ref = jnp.einsum('nctv,tvw->nctw', x, A)
    assert out.shape == (N, C, T, W)
    assert jnp.allclose(out, ref, atol=1e-4, rtol=1e-4)

    print("KERNEL_OK")
</pallas_src>

<mosaic_0001>
module attributes {stable_mosaic.version = 11 : i64} {
  func.func @_gcn_blockdiag_kernel(%arg0: i32, %arg1: memref<8x128xf32, #tpu.memory_space<vmem>>, %arg2: memref<128x128xf32, #tpu.memory_space<vmem>>, %arg3: memref<8x128xf32, #tpu.memory_space<vmem>>) attributes {dimension_semantics = [#tpu.dimension_semantics<parallel>], iteration_bounds = array<i64: 1>, scalar_prefetch = 0 : i64, scratch_operands = 0 : i64, tpu.core_type = #tpu.core_type<tc>, window_params = [{transform_indices = @transform_0, window_bounds = array<i64: 8, 128>}, {pipeline_mode = #tpu.pipeline_mode<synchronous>, transform_indices = @transform_1, window_bounds = array<i64: 128, 128>}, {transform_indices = @transform_2, window_bounds = array<i64: 8, 128>}]} {
    %c0 = arith.constant 0 : index
    %c0_0 = arith.constant 0 : index
    %0 = vector.load %arg1[%c0, %c0_0] : memref<8x128xf32, #tpu.memory_space<vmem>>, vector<8x128xf32>
    %c0_1 = arith.constant 0 : index
    %c0_2 = arith.constant 0 : index
    %1 = vector.load %arg2[%c0_1, %c0_2] : memref<128x128xf32, #tpu.memory_space<vmem>>, vector<128x128xf32>
    %cst = arith.constant dense<0.000000e+00> : vector<8x128xf32>
    %2 = tpu.matmul %0, %1, %cst {dimension_numbers = #tpu.dot_dimension_numbers<[1], [0], [0], [1], [0, 0, 1, 1], [], []>} : vector<8x128xf32>, vector<128x128xf32>, vector<8x128xf32> -> vector<8x128xf32>
    %c0_3 = arith.constant 0 : index
    %c0_4 = arith.constant 0 : index
    %3 = vector.load %arg3[%c0_3, %c0_4] : memref<8x128xf32, #tpu.memory_space<vmem>>, vector<8x128xf32>
    tpu.vector_store %arg3[%c0_3, %c0_4], %2 {strides = array<i32>} : memref<8x128xf32, #tpu.memory_space<vmem>>, vector<8x128xf32>,
    return
  }
  func.func @transform_0(%arg0: i32) -> (i32, i32) {
    %c0_i32 = arith.constant 0 : i32
    %c0_i32_0 = arith.constant 0 : i32
    return %arg0, %c0_i32 : i32, i32
  }
  func.func @transform_1(%arg0: i32) -> (i32, i32) {
    %c0_i32 = arith.constant 0 : i32
    %c0_i32_0 = arith.constant 0 : i32
    %c0_i32_1 = arith.constant 0 : i32
    return %c0_i32, %c0_i32_0 : i32, i32
  }
  func.func @transform_2(%arg0: i32) -> (i32, i32) {
    %c0_i32 = arith.constant 0 : i32
    %c0_i32_0 = arith.constant 0 : i32
    return %arg0, %c0_i32 : i32, i32
  }
}

</mosaic_0001>

<bundles_post_ra>
// kernel: a_call__.1
= control target key start
LH: loop header
LB: loop body
LE: loop exit
PB: predicated region body
PF: predicated region fallthrough
CT: control target
= control target key end

     0   :  { %v157_v0 = vmov 0.0   ;;  %vm158_vm0 = vmmov 0   ;;  %s228_s1 = inlined_call_operand.vmem [shape: f32[128,128], index: 1, kind: input, shape index: {}]   ;;  %s229_s0 = inlined_call_operand.vmem [shape: f32[8,128], index: 0, kind: input, shape index: {}]   ;;  %s230_s2 = inlined_call_operand.vmem [shape: f32[8,128], index: 2, kind: output, shape index: {}]  }
   0x1   :  { %120 = vmatprep.subr.mxu0 %v157_v0  ;;  %v27_v1 = vld [vmem:[%s228_s1 + $0x78] sm:$0xff]  ;;  %v26_v2 = vld [vmem:[%s228_s1 + $0x70] sm:$0xff]  ;;  %152 = vmatprep.mubr.msk.f32.mxu0 %vm158_vm0, %v157_v0  ;;  %v25_v3 = vld [vmem:[%s228_s1 + $0x68] sm:$0xff] }
   0x2   :  { %121 = vmatpush3.msra.mxu0 %v27_v1  ;;  %v24_v4 = vld [vmem:[%s228_s1 + $0x60] sm:$0xff]  ;;  %v23_v5 = vld [vmem:[%s228_s1 + $0x58] sm:$0xff]  ;;  %v22_v6 = vld [vmem:[%s228_s1 + $0x50] sm:$0xff] }
   0x3   :  { %122 = vmatprep.subr.mxu0 %v157_v0  ;;  %v21_v7 = vld [vmem:[%s228_s1 + $0x48] sm:$0xff]  ;;  %v20_v8 = vld [vmem:[%s228_s1 + $0x40] sm:$0xff]  ;;  %v19_v9 = vld [vmem:[%s228_s1 + $0x38] sm:$0xff] }
   0x4   :  { %123 = vmatpush3.msra.mxu0 %v26_v2  ;;  %v18_v10 = vld [vmem:[%s228_s1 + $0x30] sm:$0xff]  ;;  %v17_v11 = vld [vmem:[%s228_s1 + $0x28] sm:$0xff]  ;;  %v16_v12 = vld [vmem:[%s228_s1 + $0x20] sm:$0xff] }
   0x5   :  { %124 = vmatprep.subr.mxu0 %v157_v0  ;;  %v15_v13 = vld [vmem:[%s228_s1 + $0x18] sm:$0xff]  ;;  %v14_v14 = vld [vmem:[%s228_s1 + $0x10] sm:$0xff]  ;;  %v13_v15 = vld [vmem:[%s228_s1 + $0x8] sm:$0xff] }
   0x6   :  { %125 = vmatpush3.msra.mxu0 %v25_v3  ;;  %v12_v16 = vld [vmem:[%s228_s1] sm:$0xff] }
   0x7   :  { %126 = vmatprep.subr.mxu0 %v157_v0  ;;  %v11_v17 = vld [vmem:[%s229_s0] sm:$0xff] }
   0x8   :  { %127 = vmatpush3.msra.mxu0 %v24_v4 }
   0x9   :  { %128 = vmatprep.subr.mxu0 %v157_v0 }
   0xa   :  { %129 = vmatpush3.msra.mxu0 %v23_v5 }
   0xb   :  { %130 = vmatprep.subr.mxu0 %v157_v0 }
   0xc   :  { %131 = vmatpush3.msra.mxu0 %v22_v6 }
   0xd   :  { %132 = vmatprep.subr.mxu0 %v157_v0 }
   0xe   :  { %133 = vmatpush3.msra.mxu0 %v21_v7 }
   0xf   :  { %134 = vmatprep.subr.mxu0 %v157_v0 }
  0x10   :  { %135 = vmatpush3.msra.mxu0 %v20_v8 }
  0x11   :  { %136 = vmatprep.subr.mxu0 %v157_v0 }
  0x12   :  { %137 = vmatpush3.msra.mxu0 %v19_v9 }
  0x13   :  { %138 = vmatprep.subr.mxu0 %v157_v0 }
  0x14   :  { %139 = vmatpush3.msra.mxu0 %v18_v10 }
  0x15   :  { %140 = vmatprep.subr.mxu0 %v157_v0 }
  0x16   :  { %141 = vmatpush3.msra.mxu0 %v17_v11 }
  0x17   :  { %142 = vmatprep.subr.mxu0 %v157_v0 }
  0x18   :  { %143 = vmatpush3.msra.mxu0 %v16_v12 }
  0x19   :  { %144 = vmatprep.subr.mxu0 %v157_v0 }
  0x1a   :  { %145 = vmatpush3.msra.mxu0 %v15_v13 }
  0x1b   :  { %146 = vmatprep.subr.mxu0 %v157_v0 }
  0x1c   :  { %147 = vmatpush3.msra.mxu0 %v14_v14 }
  0x1d   :  { %148 = vmatprep.subr.mxu0 %v157_v0 }
  0x1e   :  { %149 = vmatpush3.msra.mxu0 %v13_v15 }
  0x1f   :  { %150 = vmatprep.subr.mxu0 %v157_v0 }
  0x20   :  { %151 = vmatpush3.msra.mxu0 %v12_v16 }
  0x21   :  { %153 = vmatmul.mubr.f32.vlgmr.msra.gmra.mxu0 %v11_v17 }
  0xe1   :  { %v94_v18 = vpop.f32.mrf.mxu0 }
  0xe2   :  { %98 = vst [vmem:[%s230_s2] sm:$0xff] %v94_v18 }
  0xe3   :  { %v154_v19 = vpop.f32.mrf.mxu0 }

</bundles_post_ra>
